<compile_context>
chip_gen: v6e
topology: v6e:2x2x1
jax: 0.10.0
libtpu: 0.0.40
codegen_flags: <defaults>
</compile_context>

<pallas_src>
import functools

import jax
import jax.numpy as jnp
from jax import lax
from jax.experimental import pallas as pl
from jax.experimental.pallas import tpu as pltpu

BIG = 9999999.0
NEG_FILL = -1.0e30
POS_FILL = 1.0e30


def _triplet_kernel(emb_r_ref, emb_c_ref, clot_r_ref, clot_c_ref,
                    xx_ref, yy_ref, labc_ref, labr_ref,
                    t11_ref, t13_ref, prec_ref,
                    p1_s, a1_s, p2_s, a2_s, n1_s,
                    *, margin: float, n: int, n_pad: int, bm: int, bn: int):
    j = pl.program_id(1)
    nj = pl.num_programs(1)

    # ---- init running mining state at the first column block ----
    @pl.when(j == 0)
    def _init():
        p1_s[...] = jnp.full((bm, 1), NEG_FILL, jnp.float32)
        p2_s[...] = jnp.full((bm, 1), NEG_FILL, jnp.float32)
        a1_s[...] = jnp.zeros((bm, 1), jnp.float32)
        a2_s[...] = jnp.zeros((bm, 1), jnp.float32)
        n1_s[...] = jnp.full((bm, 1), POS_FILL, jnp.float32)

    # ---- Gram blocks on the MXU (native dtype operands, f32 accumulation) ----
    emb_blk = emb_r_ref[...]                                   # [bm, D]
    # fold -2 into the small LHS operand (exact power-of-two scale)
    gram = lax.dot_general(emb_blk * jnp.asarray(-2.0, emb_blk.dtype),
                           emb_c_ref[...],
                           (((1,), (1,)), ((), ())),
                           preferred_element_type=jnp.float32)  # [bm, bn]
    # clot rows are pre-normalized -> this is already the cosine matrix
    cos = lax.dot_general(clot_r_ref[...], clot_c_ref[...],
                          (((1,), (1,)), ((), ())),
                          preferred_element_type=jnp.float32)   # [bm, bn]

    # squared euclidean distances; mining happens in the squared domain
    dist_sq = jnp.maximum(xx_ref[...] + yy_ref[...] + gram, 1e-12)

    same = labc_ref[...] == labr_ref[...]                       # [bm, bn] bool
    pos_sq = jnp.where(same, dist_sq, dist_sq - BIG)
    neg_sq = jnp.where(same, dist_sq + BIG, dist_sq)

    col = lax.broadcasted_iota(jnp.int32, (bm, bn), 1)
    if n_pad != n:                                  # exclude zero-padded columns
        col_valid = (j * bn + col) < n
        pos_sq = jnp.where(col_valid, pos_sq, NEG_FILL)
        neg_sq = jnp.where(col_valid, neg_sq, POS_FILL)

    # ---- block-local batch-hard mining (top-2 pos, first-occurrence ties) ----
    w1 = jnp.max(pos_sq, axis=1, keepdims=True)
    idx1 = jnp.where(pos_sq == w1, col, bn)
    loc1 = jnp.min(idx1, axis=1, keepdims=True)
    m1 = idx1 == loc1                                           # one-hot argmax
    aw1 = jnp.sum(jnp.where(m1, cos, 0.0), axis=1, keepdims=True)

    pos_m = jnp.where(m1, NEG_FILL, pos_sq)
    w2 = jnp.max(pos_m, axis=1, keepdims=True)
    idx2 = jnp.where(pos_m == w2, col, bn)
    loc2 = jnp.min(idx2, axis=1, keepdims=True)
    m2 = idx2 == loc2
    aw2 = jnp.sum(jnp.where(m2, cos, 0.0), axis=1, keepdims=True)

    wn = jnp.min(neg_sq, axis=1, keepdims=True)

    # ---- merge block-local top-2 with running state (ties -> running, i.e.
    #      earlier/smaller global index == first occurrence) ----
    v1, av1 = p1_s[...], a1_s[...]
    v2, av2 = p2_s[...], a2_s[...]
    take1 = w1 > v1
    p1_s[...] = jnp.where(take1, w1, v1)
    a1_s[...] = jnp.where(take1, aw1, av1)
    p2_s[...] = jnp.where(take1, jnp.where(w2 > v1, w2, v1),
                          jnp.where(w1 > v2, w1, v2))
    a2_s[...] = jnp.where(take1, jnp.where(w2 > v1, aw2, av1),
                          jnp.where(w1 > v2, aw1, av2))
    n1_s[...] = jnp.minimum(n1_s[...], wn)

    # ---- finalize: map mined squared values back to (shifted) distances and
    #      emit the per-row margin-ranking loss terms ----
    @pl.when(j == nj - 1)
    def _finalize():
        p1 = p1_s[...]
        p2 = p2_s[...]
        nn = n1_s[...]
        a1 = a1_s[...]
        a2 = a2_s[...]

        # hardest positive always exists (diagonal) -> unshifted
        dist_ap1 = jnp.sqrt(jnp.maximum(p1, 1e-12))
        p2_pos = p2 >= 0.0
        d2v = jnp.sqrt(jnp.maximum(jnp.where(p2_pos, p2, p2 + BIG), 1e-12))
        dist_ap2 = jnp.where(p2_pos, d2v, d2v - BIG)
        n_shift = nn >= BIG
        dnv = jnp.sqrt(jnp.maximum(jnp.where(n_shift, nn - BIG, nn), 1e-12))
        dist_an = jnp.where(n_shift, dnv + BIG, dnv)

        y11 = jnp.where(a1 < a2, -1.0, 1.0)
        y11_m = jnp.where(a1 == a2, 0.0, 1.0)
        x1 = dist_ap2 * y11_m
        x2 = dist_ap1 * y11_m + margin * (a1 - a2 - y11)
        t11 = jnp.maximum(-y11 * (x1 - x2) + margin, 0.0)

        ap1_mod = dist_ap1 + margin * (a1 - 1.0)
        t13 = jnp.maximum(-(dist_an - ap1_mod) + margin, 0.0)
        tprec = (dist_an > ap1_mod).astype(jnp.float32)

        if n_pad != n:                      # zero contributions of padded rows
            row_ids = pl.program_id(0) * bm + lax.broadcasted_iota(
                jnp.int32, (bm, 1), 0)
            row_valid = row_ids < n
            t11 = jnp.where(row_valid, t11, 0.0)
            t13 = jnp.where(row_valid, t13, 0.0)
            tprec = jnp.where(row_valid, tprec, 0.0)

        t11_ref[...] = t11
        t13_ref[...] = t13
        prec_ref[...] = tprec


def _round_up(x, m):
    return (x + m - 1) // m * m


def _vmem_estimate(bm, bn, d, d2, it_e, it_c):
    # double-buffered input blocks + live [bm, bn] f32 temporaries + scratch/outs
    blocks = (bm * d + bn * d) * it_e + (bm * d2 + bn * d2) * it_c \
        + (bm + bn) * 2 * 4
    temps = 12 * bm * bn * 4
    scratch = 5 * bm * 128 * 4
    outs = 2 * 3 * bm * 128 * 4
    return 2 * blocks + temps + scratch + outs + (2 << 20)


def triplet_loss(emb, label, clot_feats_s, *, margin=0.3, normalize_feature=False):
    """Pallas TPU implementation of TripletLoss.forward. Returns (loss, prec)."""
    emb = jnp.asarray(emb)
    clot = jnp.asarray(clot_feats_s)
    n, d = emb.shape
    d2 = clot.shape[1]

    if normalize_feature:
        nrm = jnp.sqrt(jnp.sum(jnp.square(emb.astype(jnp.float32)), axis=1,
                               keepdims=True))
        emb = (emb.astype(jnp.float32) / jnp.maximum(nrm, 1e-12)).astype(emb.dtype)

    # pre-normalize clothes features once (eps guards all-zero / padded rows)
    cn = jnp.sqrt(jnp.sum(jnp.square(clot.astype(jnp.float32)), axis=1,
                          keepdims=True))
    clot_n = (clot.astype(jnp.float32) / jnp.maximum(cn, 1e-12)).astype(clot.dtype)

    it_e = jnp.dtype(emb.dtype).itemsize
    it_c = jnp.dtype(clot_n.dtype).itemsize

    # ---- generation-aware VMEM budget (v7x: 64 MiB physical; v5e/v6e: 128) ----
    try:
        cap = int(pltpu.get_tpu_info().vmem_capacity_bytes)
    except Exception:
        cap = 64 << 20
    budget = (cap * 3) // 4

    # ---- block-size selection ----
    n8 = _round_up(max(n, 1), 8)
    if n8 <= 512 and _vmem_estimate(n8, n8, d, d2, it_e, it_c) <= budget:
        n_pad = n8
        bn = n_pad
        # give the "parallel" row axis >= 2 steps so both v7x TCs get work
        bm = n_pad // 2 if (n_pad >= 256 and n_pad % 16 == 0) else n_pad
    else:
        bm, bn = 256, 512
        while _vmem_estimate(bm, bn, d, d2, it_e, it_c) > budget and \
                (bm > 128 or bn > 128):
            if bn > 128:
                bn //= 2
            else:
                bm //= 2
        n_pad = _round_up(n, max(bm, bn))

    pad = n_pad - n
    lab = jnp.asarray(label).astype(jnp.int32).reshape(n)
    if pad:
        emb_p = jnp.pad(emb, ((0, pad), (0, 0)))
        clot_p = jnp.pad(clot_n, ((0, pad), (0, 0)))
        lab_p = jnp.pad(lab, (0, pad), constant_values=-1)
    else:
        emb_p, clot_p, lab_p = emb, clot_n, lab

    # row squared norms precomputed once in f32
    xx = jnp.sum(jnp.square(emb_p.astype(jnp.float32)), axis=1)
    xx_col = xx.reshape(n_pad, 1)
    yy_row = xx.reshape(1, n_pad)
    lab_col = lab_p.reshape(n_pad, 1)
    lab_row = lab_p.reshape(1, n_pad)

    grid = (n_pad // bm, n_pad // bn)
    kernel = functools.partial(_triplet_kernel, margin=float(margin),
                               n=n, n_pad=n_pad, bm=bm, bn=bn)

    row_blk = lambda i, j: (i, 0)
    col_blk = lambda i, j: (j, 0)
    col_vec = lambda i, j: (0, j)

    grid_spec = pltpu.PrefetchScalarGridSpec(
        num_scalar_prefetch=0,
        grid=grid,
        in_specs=[
            pl.BlockSpec((bm, d), row_blk),    # emb     (query rows)
            pl.BlockSpec((bn, d), col_blk),    # emb     (key columns)
            pl.BlockSpec((bm, d2), row_blk),   # clot_n  (rows)
            pl.BlockSpec((bn, d2), col_blk),   # clot_n  (columns)
            pl.BlockSpec((bm, 1), row_blk),    # xx      (row sq-norms)
            pl.BlockSpec((1, bn), col_vec),    # yy      (col sq-norms)
            pl.BlockSpec((bm, 1), row_blk),    # labels  (rows)
            pl.BlockSpec((1, bn), col_vec),    # labels  (cols)
        ],
        out_specs=[
            pl.BlockSpec((bm, 1), row_blk),
            pl.BlockSpec((bm, 1), row_blk),
            pl.BlockSpec((bm, 1), row_blk),
        ],
        scratch_shapes=[pltpu.VMEM((bm, 1), jnp.float32)] * 5,
    )

    out_shape = (
        jax.ShapeDtypeStruct((n_pad, 1), jnp.float32),
        jax.ShapeDtypeStruct((n_pad, 1), jnp.float32),
        jax.ShapeDtypeStruct((n_pad, 1), jnp.float32),
    )

    vmem_limit = int(min(max(_vmem_estimate(bm, bn, d, d2, it_e, it_c),
                             32 << 20), (cap * 7) // 8))
    flops = int(2 * n_pad * n_pad * (d + d2))
    bytes_accessed = int((n_pad // bm) * n_pad * (d * it_e + d2 * it_c)
                         + n_pad * (d * it_e + d2 * it_c) + 10 * n_pad * 4)

    t11, t13, tprec = pl.pallas_call(
        kernel,
        grid_spec=grid_spec,
        out_shape=out_shape,
        compiler_params=pltpu.CompilerParams(
            dimension_semantics=("parallel", "arbitrary"),
            vmem_limit_bytes=vmem_limit),
        cost_estimate=pl.CostEstimate(flops=flops,
                                      transcendentals=4 * n_pad,
                                      bytes_accessed=bytes_accessed),
    )(emb_p, emb_p, clot_p, clot_p, xx_col, yy_row, lab_col, lab_row)

    inv_n = 1.0 / float(n)
    loss11 = jnp.sum(t11) * inv_n
    loss13 = jnp.sum(t13) * inv_n
    loss = 0.1 * loss11 + loss13
    prec = jnp.sum(tprec) * inv_n
    return loss, prec


def _reference(emb, label, clot, margin=0.3):
    """Plain-JAX reference mirroring the PyTorch semantics (argmax tie = first)."""
    n = emb.shape[0]
    xx = jnp.sum(emb * emb, axis=1, keepdims=True)
    dist = jnp.sqrt(jnp.maximum(xx + xx.T - 2.0 * emb @ emb.T, 1e-12))
    cnrm = jnp.sqrt(jnp.sum(clot * clot, axis=1, keepdims=True))
    cos = (clot @ clot.T) / (cnrm * cnrm.T)
    sim = (label[:, None] == label[None, :]).astype(jnp.float32)
    pos = dist - BIG * (1.0 - sim)
    neg = dist + BIG * sim
    p1_idx = jnp.argmax(pos, axis=1)
    p1 = pos[jnp.arange(n), p1_idx]
    pos_m = pos.at[jnp.arange(n), p1_idx].set(NEG_FILL)
    p2_idx = jnp.argmax(pos_m, axis=1)
    p2 = pos_m[jnp.arange(n), p2_idx]
    an = jnp.min(neg, axis=1)
    a1 = cos[jnp.arange(n), p1_idx]
    a2 = cos[jnp.arange(n), p2_idx]
    y11 = jnp.where(a1 < a2, -1.0, 1.0)
    y11m = jnp.where(a1 == a2, 0.0, 1.0)
    x1 = p2 * y11m
    x2 = p1 * y11m + margin * (a1 - a2 - y11)
    loss11 = jnp.mean(jnp.maximum(-y11 * (x1 - x2) + margin, 0.0))
    ap1m = p1 + margin * (a1 - 1.0)
    loss13 = jnp.mean(jnp.maximum(-(an - ap1m) + margin, 0.0))
    loss = 0.1 * loss11 + loss13
    prec = jnp.sum((an > ap1m).astype(jnp.float32)) / n
    return loss, prec


if __name__ == "__main__":
    key = jax.random.PRNGKey(0)
    k1, k2 = jax.random.split(key)
    N, D, D2 = 8, 32, 32
    emb = jax.random.normal(k1, (N, D), dtype=jnp.float32)
    clot = jax.random.normal(k2, (N, D2), dtype=jnp.float32)
    # 4 classes x 2 samples -> every row has positives and negatives
    label = jnp.array([0, 0, 1, 1, 2, 2, 3, 3], dtype=jnp.int32)

    loss, prec = triplet_loss(emb, label, clot, margin=0.3)
    jax.block_until_ready((loss, prec))

    ref_loss, ref_prec = _reference(emb, label, clot, margin=0.3)
    assert jnp.allclose(loss, ref_loss, rtol=1e-3, atol=1e-3), (loss, ref_loss)
    assert jnp.allclose(prec, ref_prec, rtol=1e-3, atol=1e-3), (prec, ref_prec)

    print("KERNEL_OK")
</pallas_src>

<mosaic_0001>
module attributes {stable_mosaic.version = 11 : i64} {
  func.func @_triplet_kernel(%arg0: i32, %arg1: i32, %arg2: memref<8x32xf32, #tpu.memory_space<vmem>>, %arg3: memref<8x32xf32, #tpu.memory_space<vmem>>, %arg4: memref<8x32xf32, #tpu.memory_space<vmem>>, %arg5: memref<8x32xf32, #tpu.memory_space<vmem>>, %arg6: memref<8x1xf32, #tpu.memory_space<vmem>>, %arg7: memref<1x8xf32, #tpu.memory_space<vmem>>, %arg8: memref<8x1xi32, #tpu.memory_space<vmem>>, %arg9: memref<1x8xi32, #tpu.memory_space<vmem>>, %arg10: memref<8x1xf32, #tpu.memory_space<vmem>>, %arg11: memref<8x1xf32, #tpu.memory_space<vmem>>, %arg12: memref<8x1xf32, #tpu.memory_space<vmem>>, %arg13: memref<8x1xf32, #tpu.memory_space<vmem>>, %arg14: memref<8x1xf32, #tpu.memory_space<vmem>>, %arg15: memref<8x1xf32, #tpu.memory_space<vmem>>, %arg16: memref<8x1xf32, #tpu.memory_space<vmem>>, %arg17: memref<8x1xf32, #tpu.memory_space<vmem>>) attributes {dimension_semantics = [#tpu.dimension_semantics<parallel>, #tpu.dimension_semantics<arbitrary>], iteration_bounds = array<i64: 1, 1>, scalar_prefetch = 0 : i64, scratch_operands = 5 : i64, tpu.core_type = #tpu.core_type<tc>, window_params = [{transform_indices = @transform_0, window_bounds = array<i64: 8, 32>}, {transform_indices = @transform_1, window_bounds = array<i64: 8, 32>}, {transform_indices = @transform_2, window_bounds = array<i64: 8, 32>}, {transform_indices = @transform_3, window_bounds = array<i64: 8, 32>}, {transform_indices = @transform_4, window_bounds = array<i64: 8, 1>}, {transform_indices = @transform_5, window_bounds = array<i64: 1, 8>}, {transform_indices = @transform_6, window_bounds = array<i64: 8, 1>}, {transform_indices = @transform_7, window_bounds = array<i64: 1, 8>}, {transform_indices = @transform_8, window_bounds = array<i64: 8, 1>}, {transform_indices = @transform_9, window_bounds = array<i64: 8, 1>}, {transform_indices = @transform_10, window_bounds = array<i64: 8, 1>}]} {
    %c0_i32 = arith.constant 0 : i32
    %0 = arith.cmpi eq, %arg1, %c0_i32 : i32
    %1 = arith.extui %0 : i1 to i32
    %c0_i32_0 = arith.constant 0 : i32
    %2 = arith.cmpi ne, %1, %c0_i32_0 : i32
    scf.if %2 {
      %cst_54 = arith.constant -1.000000e+30 : f32
      %90 = vector.broadcast %cst_54 : f32 to vector<8x1xf32>
      %c0_55 = arith.constant 0 : index
      %c0_56 = arith.constant 0 : index
      %91 = vector.load %arg13[%c0_55, %c0_56] : memref<8x1xf32, #tpu.memory_space<vmem>>, vector<8x1xf32>
      tpu.vector_store %arg13[%c0_55, %c0_56], %90 {strides = array<i32>} : memref<8x1xf32, #tpu.memory_space<vmem>>, vector<8x1xf32>,
      %cst_57 = arith.constant -1.000000e+30 : f32
      %92 = vector.broadcast %cst_57 : f32 to vector<8x1xf32>
      %c0_58 = arith.constant 0 : index
      %c0_59 = arith.constant 0 : index
      %93 = vector.load %arg15[%c0_58, %c0_59] : memref<8x1xf32, #tpu.memory_space<vmem>>, vector<8x1xf32>
      tpu.vector_store %arg15[%c0_58, %c0_59], %92 {strides = array<i32>} : memref<8x1xf32, #tpu.memory_space<vmem>>, vector<8x1xf32>,
      %cst_60 = arith.constant 0.000000e+00 : f32
      %94 = vector.broadcast %cst_60 : f32 to vector<8x1xf32>
      %c0_61 = arith.constant 0 : index
      %c0_62 = arith.constant 0 : index
      %95 = vector.load %arg14[%c0_61, %c0_62] : memref<8x1xf32, #tpu.memory_space<vmem>>, vector<8x1xf32>
      tpu.vector_store %arg14[%c0_61, %c0_62], %94 {strides = array<i32>} : memref<8x1xf32, #tpu.memory_space<vmem>>, vector<8x1xf32>,
      %cst_63 = arith.constant 0.000000e+00 : f32
      %96 = vector.broadcast %cst_63 : f32 to vector<8x1xf32>
      %c0_64 = arith.constant 0 : index
      %c0_65 = arith.constant 0 : index
      %97 = vector.load %arg16[%c0_64, %c0_65] : memref<8x1xf32, #tpu.memory_space<vmem>>, vector<8x1xf32>
      tpu.vector_store %arg16[%c0_64, %c0_65], %96 {strides = array<i32>} : memref<8x1xf32, #tpu.memory_space<vmem>>, vector<8x1xf32>,
      %cst_66 = arith.constant 1.000000e+30 : f32
      %98 = vector.broadcast %cst_66 : f32 to vector<8x1xf32>
      %c0_67 = arith.constant 0 : index
      %c0_68 = arith.constant 0 : index
      %99 = vector.load %arg17[%c0_67, %c0_68] : memref<8x1xf32, #tpu.memory_space<vmem>>, vector<8x1xf32>
      tpu.vector_store %arg17[%c0_67, %c0_68], %98 {strides = array<i32>} : memref<8x1xf32, #tpu.memory_space<vmem>>, vector<8x1xf32>,
    } else {
    }
    %c0 = arith.constant 0 : index
    %c0_1 = arith.constant 0 : index
    %3 = vector.load %arg2[%c0, %c0_1] : memref<8x32xf32, #tpu.memory_space<vmem>>, vector<8x32xf32>
    %cst = arith.constant -2.000000e+00 : f32
    %4 = vector.broadcast %cst : f32 to vector<8x32xf32>
    %5 = arith.mulf %3, %4 : vector<8x32xf32>
    %c0_2 = arith.constant 0 : index
    %c0_3 = arith.constant 0 : index
    %6 = vector.load %arg3[%c0_2, %c0_3] : memref<8x32xf32, #tpu.memory_space<vmem>>, vector<8x32xf32>
    %cst_4 = arith.constant dense<0.000000e+00> : vector<8x8xf32>
    %7 = tpu.matmul %5, %6, %cst_4 {dimension_numbers = #tpu.dot_dimension_numbers<[1], [1], [0], [0], [0, 0, 1, 0], [], []>} : vector<8x32xf32>, vector<8x32xf32>, vector<8x8xf32> -> vector<8x8xf32>
    %c0_5 = arith.constant 0 : index
    %c0_6 = arith.constant 0 : index
    %8 = vector.load %arg4[%c0_5, %c0_6] : memref<8x32xf32, #tpu.memory_space<vmem>>, vector<8x32xf32>
    %c0_7 = arith.constant 0 : index
    %c0_8 = arith.constant 0 : index
    %9 = vector.load %arg5[%c0_7, %c0_8] : memref<8x32xf32, #tpu.memory_space<vmem>>, vector<8x32xf32>
    %cst_9 = arith.constant dense<0.000000e+00> : vector<8x8xf32>
    %10 = tpu.matmul %8, %9, %cst_9 {dimension_numbers = #tpu.dot_dimension_numbers<[1], [1], [0], [0], [0, 0, 1, 0], [], []>} : vector<8x32xf32>, vector<8x32xf32>, vector<8x8xf32> -> vector<8x8xf32>
    %c0_10 = arith.constant 0 : index
    %c0_11 = arith.constant 0 : index
    %11 = vector.load %arg6[%c0_10, %c0_11] : memref<8x1xf32, #tpu.memory_space<vmem>>, vector<8x1xf32>
    %c0_12 = arith.constant 0 : index
    %c0_13 = arith.constant 0 : index
    %12 = vector.load %arg7[%c0_12, %c0_13] : memref<1x8xf32, #tpu.memory_space<vmem>>, vector<1x8xf32>
    %13 = vector.broadcast %11 : vector<8x1xf32> to vector<8x8xf32>
    %14 = vector.broadcast %12 : vector<1x8xf32> to vector<8x8xf32>
    %15 = arith.addf %13, %14 : vector<8x8xf32>
    %16 = arith.addf %15, %7 : vector<8x8xf32>
    %cst_14 = arith.constant 9.99999996E-13 : f32
    %17 = vector.broadcast %cst_14 : f32 to vector<8x8xf32>
    %18 = arith.maximumf %16, %17 : vector<8x8xf32>
    %c0_15 = arith.constant 0 : index
    %c0_16 = arith.constant 0 : index
    %19 = vector.load %arg8[%c0_15, %c0_16] : memref<8x1xi32, #tpu.memory_space<vmem>>, vector<8x1xi32>
    %c0_17 = arith.constant 0 : index
    %c0_18 = arith.constant 0 : index
    %20 = vector.load %arg9[%c0_17, %c0_18] : memref<1x8xi32, #tpu.memory_space<vmem>>, vector<1x8xi32>
    %21 = vector.broadcast %19 : vector<8x1xi32> to vector<8x8xi32>
    %22 = vector.broadcast %20 : vector<1x8xi32> to vector<8x8xi32>
    %23 = arith.cmpi eq, %21, %22 : vector<8x8xi32>
    %cst_19 = arith.constant 0x4B18967F : f32
    %24 = vector.broadcast %cst_19 : f32 to vector<8x8xf32>
    %25 = arith.subf %18, %24 : vector<8x8xf32>
    %26 = arith.select %23, %18, %25 : vector<8x8xi1>, vector<8x8xf32>
    %cst_20 = arith.constant 0x4B18967F : f32
    %27 = vector.broadcast %cst_20 : f32 to vector<8x8xf32>
    %28 = arith.addf %18, %27 : vector<8x8xf32>
    %29 = arith.select %23, %28, %18 : vector<8x8xi1>, vector<8x8xf32>
    %30 = tpu.iota {dimensions = array<i32: 1>} : vector<8x8xi32>
    %cst_21 = arith.constant dense<0xFF800000> : vector<8xf32>
    %31 = vector.multi_reduction <maximumf>, %26, %cst_21 [1] : vector<8x8xf32> to vector<8xf32>
    %32 = vector.shape_cast %31 : vector<8xf32> to vector<8x1xf32>
    %33 = vector.broadcast %32 : vector<8x1xf32> to vector<8x8xf32>
    %34 = arith.cmpf oeq, %26, %33 : vector<8x8xf32>
    %c8_i32 = arith.constant 8 : i32
    %35 = vector.broadcast %c8_i32 : i32 to vector<8x8xi32>
    %36 = arith.select %34, %30, %35 : vector<8x8xi1>, vector<8x8xi32>
    %cst_22 = arith.constant dense<2147483647> : vector<8xi32>
    %37 = vector.multi_reduction <minsi>, %36, %cst_22 [1] : vector<8x8xi32> to vector<8xi32>
    %38 = vector.shape_cast %37 : vector<8xi32> to vector<8x1xi32>
    %39 = vector.broadcast %38 : vector<8x1xi32> to vector<8x8xi32>
    %40 = arith.cmpi eq, %36, %39 : vector<8x8xi32>
    %cst_23 = arith.constant 0.000000e+00 : f32
    %41 = vector.broadcast %cst_23 : f32 to vector<8x8xf32>
    %42 = arith.select %40, %10, %41 : vector<8x8xi1>, vector<8x8xf32>
    %cst_24 = arith.constant dense<0.000000e+00> : vector<8xf32>
    %43 = vector.multi_reduction <add>, %42, %cst_24 [1] : vector<8x8xf32> to vector<8xf32>
    %44 = vector.shape_cast %43 : vector<8xf32> to vector<8x1xf32>
    %cst_25 = arith.constant -1.000000e+30 : f32
    %45 = vector.broadcast %cst_25 : f32 to vector<8x8xf32>
    %46 = arith.select %40, %45, %26 : vector<8x8xi1>, vector<8x8xf32>
    %cst_26 = arith.constant dense<0xFF800000> : vector<8xf32>
    %47 = vector.multi_reduction <maximumf>, %46, %cst_26 [1] : vector<8x8xf32> to vector<8xf32>
    %48 = vector.shape_cast %47 : vector<8xf32> to vector<8x1xf32>
    %49 = vector.broadcast %48 : vector<8x1xf32> to vector<8x8xf32>
    %50 = arith.cmpf oeq, %46, %49 : vector<8x8xf32>
    %c8_i32_27 = arith.constant 8 : i32
    %51 = vector.broadcast %c8_i32_27 : i32 to vector<8x8xi32>
    %52 = arith.select %50, %30, %51 : vector<8x8xi1>, vector<8x8xi32>
    %cst_28 = arith.constant dense<2147483647> : vector<8xi32>
    %53 = vector.multi_reduction <minsi>, %52, %cst_28 [1] : vector<8x8xi32> to vector<8xi32>
    %54 = vector.shape_cast %53 : vector<8xi32> to vector<8x1xi32>
    %55 = vector.broadcast %54 : vector<8x1xi32> to vector<8x8xi32>
    %56 = arith.cmpi eq, %52, %55 : vector<8x8xi32>
    %cst_29 = arith.constant 0.000000e+00 : f32
    %57 = vector.broadcast %cst_29 : f32 to vector<8x8xf32>
    %58 = arith.select %56, %10, %57 : vector<8x8xi1>, vector<8x8xf32>
    %cst_30 = arith.constant dense<0.000000e+00> : vector<8xf32>
    %59 = vector.multi_reduction <add>, %58, %cst_30 [1] : vector<8x8xf32> to vector<8xf32>
    %60 = vector.shape_cast %59 : vector<8xf32> to vector<8x1xf32>
    %cst_31 = arith.constant dense<0x7F800000> : vector<8xf32>
    %61 = vector.multi_reduction <minimumf>, %29, %cst_31 [1] : vector<8x8xf32> to vector<8xf32>
    %62 = vector.shape_cast %61 : vector<8xf32> to vector<8x1xf32>
    %c0_32 = arith.constant 0 : index
    %c0_33 = arith.constant 0 : index
    %63 = vector.load %arg13[%c0_32, %c0_33] : memref<8x1xf32, #tpu.memory_space<vmem>>, vector<8x1xf32>
    %c0_34 = arith.constant 0 : index
    %c0_35 = arith.constant 0 : index
    %64 = vector.load %arg14[%c0_34, %c0_35] : memref<8x1xf32, #tpu.memory_space<vmem>>, vector<8x1xf32>
    %c0_36 = arith.constant 0 : index
    %c0_37 = arith.constant 0 : index
    %65 = vector.load %arg15[%c0_36, %c0_37] : memref<8x1xf32, #tpu.memory_space<vmem>>, vector<8x1xf32>
    %c0_38 = arith.constant 0 : index
    %c0_39 = arith.constant 0 : index
    %66 = vector.load %arg16[%c0_38, %c0_39] : memref<8x1xf32, #tpu.memory_space<vmem>>, vector<8x1xf32>
    %67 = arith.cmpf ogt, %32, %63 : vector<8x1xf32>
    %68 = arith.select %67, %32, %63 : vector<8x1xi1>, vector<8x1xf32>
    %c0_40 = arith.constant 0 : index
    %c0_41 = arith.constant 0 : index
    %69 = vector.load %arg13[%c0_40, %c0_41] : memref<8x1xf32, #tpu.memory_space<vmem>>, vector<8x1xf32>
    tpu.vector_store %arg13[%c0_40, %c0_41], %68 {strides = array<i32>} : memref<8x1xf32, #tpu.memory_space<vmem>>, vector<8x1xf32>,
    %70 = arith.select %67, %44, %64 : vector<8x1xi1>, vector<8x1xf32>
    %c0_42 = arith.constant 0 : index
    %c0_43 = arith.constant 0 : index
    %71 = vector.load %arg14[%c0_42, %c0_43] : memref<8x1xf32, #tpu.memory_space<vmem>>, vector<8x1xf32>
    tpu.vector_store %arg14[%c0_42, %c0_43], %70 {strides = array<i32>} : memref<8x1xf32, #tpu.memory_space<vmem>>, vector<8x1xf32>,
    %72 = arith.cmpf ogt, %48, %63 : vector<8x1xf32>
    %73 = arith.select %72, %48, %63 : vector<8x1xi1>, vector<8x1xf32>
    %74 = arith.cmpf ogt, %32, %65 : vector<8x1xf32>
    %75 = arith.select %74, %32, %65 : vector<8x1xi1>, vector<8x1xf32>
    %76 = arith.select %67, %73, %75 : vector<8x1xi1>, vector<8x1xf32>
    %c0_44 = arith.constant 0 : index
    %c0_45 = arith.constant 0 : index
    %77 = vector.load %arg15[%c0_44, %c0_45] : memref<8x1xf32, #tpu.memory_space<vmem>>, vector<8x1xf32>
    tpu.vector_store %arg15[%c0_44, %c0_45], %76 {strides = array<i32>} : memref<8x1xf32, #tpu.memory_space<vmem>>, vector<8x1xf32>,
    %78 = arith.cmpf ogt, %48, %63 : vector<8x1xf32>
    %79 = arith.select %78, %60, %64 : vector<8x1xi1>, vector<8x1xf32>
    %80 = arith.cmpf ogt, %32, %65 : vector<8x1xf32>
    %81 = arith.select %80, %44, %66 : vector<8x1xi1>, vector<8x1xf32>
    %82 = arith.select %67, %79, %81 : vector<8x1xi1>, vector<8x1xf32>
    %c0_46 = arith.constant 0 : index
    %c0_47 = arith.constant 0 : index
    %83 = vector.load %arg16[%c0_46, %c0_47] : memref<8x1xf32, #tpu.memory_space<vmem>>, vector<8x1xf32>
    tpu.vector_store %arg16[%c0_46, %c0_47], %82 {strides = array<i32>} : memref<8x1xf32, #tpu.memory_space<vmem>>, vector<8x1xf32>,
    %c0_48 = arith.constant 0 : index
    %c0_49 = arith.constant 0 : index
    %84 = vector.load %arg17[%c0_48, %c0_49] : memref<8x1xf32, #tpu.memory_space<vmem>>, vector<8x1xf32>
    %85 = arith.minimumf %84, %62 : vector<8x1xf32>
    %c0_50 = arith.constant 0 : index
    %c0_51 = arith.constant 0 : index
    %86 = vector.load %arg17[%c0_50, %c0_51] : memref<8x1xf32, #tpu.memory_space<vmem>>, vector<8x1xf32>
    tpu.vector_store %arg17[%c0_50, %c0_51], %85 {strides = array<i32>} : memref<8x1xf32, #tpu.memory_space<vmem>>, vector<8x1xf32>,
    %c0_i32_52 = arith.constant 0 : i32
    %87 = arith.cmpi eq, %arg1, %c0_i32_52 : i32
    %88 = arith.extui %87 : i1 to i32
    %c0_i32_53 = arith.constant 0 : i32
    %89 = arith.cmpi ne, %88, %c0_i32_53 : i32
    scf.if %89 {
      %c0_54 = arith.constant 0 : index
      %c0_55 = arith.constant 0 : index
      %90 = vector.load %arg13[%c0_54, %c0_55] : memref<8x1xf32, #tpu.memory_space<vmem>>, vector<8x1xf32>
      %c0_56 = arith.constant 0 : index
      %c0_57 = arith.constant 0 : index
      %91 = vector.load %arg15[%c0_56, %c0_57] : memref<8x1xf32, #tpu.memory_space<vmem>>, vector<8x1xf32>
      %c0_58 = arith.constant 0 : index
      %c0_59 = arith.constant 0 : index
      %92 = vector.load %arg17[%c0_58, %c0_59] : memref<8x1xf32, #tpu.memory_space<vmem>>, vector<8x1xf32>
      %c0_60 = arith.constant 0 : index
      %c0_61 = arith.constant 0 : index
      %93 = vector.load %arg14[%c0_60, %c0_61] : memref<8x1xf32, #tpu.memory_space<vmem>>, vector<8x1xf32>
      %c0_62 = arith.constant 0 : index
      %c0_63 = arith.constant 0 : index
      %94 = vector.load %arg16[%c0_62, %c0_63] : memref<8x1xf32, #tpu.memory_space<vmem>>, vector<8x1xf32>
      %cst_64 = arith.constant 9.99999996E-13 : f32
      %95 = vector.broadcast %cst_64 : f32 to vector<8x1xf32>
      %96 = arith.maximumf %90, %95 : vector<8x1xf32>
      %97 = math.sqrt %96 : vector<8x1xf32>
      %cst_65 = arith.constant 0.000000e+00 : f32
      %98 = vector.broadcast %cst_65 : f32 to vector<8x1xf32>
      %99 = arith.cmpf oge, %91, %98 : vector<8x1xf32>
      %cst_66 = arith.constant 0x4B18967F : f32
      %100 = vector.broadcast %cst_66 : f32 to vector<8x1xf32>
      %101 = arith.addf %91, %100 : vector<8x1xf32>
      %102 = arith.select %99, %91, %101 : vector<8x1xi1>, vector<8x1xf32>
      %cst_67 = arith.constant 9.99999996E-13 : f32
      %103 = vector.broadcast %cst_67 : f32 to vector<8x1xf32>
      %104 = arith.maximumf %102, %103 : vector<8x1xf32>
      %105 = math.sqrt %104 : vector<8x1xf32>
      %cst_68 = arith.constant 0x4B18967F : f32
      %106 = vector.broadcast %cst_68 : f32 to vector<8x1xf32>
      %107 = arith.subf %105, %106 : vector<8x1xf32>
      %108 = arith.select %99, %105, %107 : vector<8x1xi1>, vector<8x1xf32>
      %cst_69 = arith.constant 0x4B18967F : f32
      %109 = vector.broadcast %cst_69 : f32 to vector<8x1xf32>
      %110 = arith.cmpf oge, %92, %109 : vector<8x1xf32>
      %cst_70 = arith.constant 0x4B18967F : f32
      %111 = vector.broadcast %cst_70 : f32 to vector<8x1xf32>
      %112 = arith.subf %92, %111 : vector<8x1xf32>
      %113 = arith.select %110, %112, %92 : vector<8x1xi1>, vector<8x1xf32>
      %cst_71 = arith.constant 9.99999996E-13 : f32
      %114 = vector.broadcast %cst_71 : f32 to vector<8x1xf32>
      %115 = arith.maximumf %113, %114 : vector<8x1xf32>
      %116 = math.sqrt %115 : vector<8x1xf32>
      %cst_72 = arith.constant 0x4B18967F : f32
      %117 = vector.broadcast %cst_72 : f32 to vector<8x1xf32>
      %118 = arith.addf %116, %117 : vector<8x1xf32>
      %119 = arith.select %110, %118, %116 : vector<8x1xi1>, vector<8x1xf32>
      %120 = arith.cmpf olt, %93, %94 : vector<8x1xf32>
      %cst_73 = arith.constant -1.000000e+00 : f32
      %cst_74 = arith.constant 1.000000e+00 : f32
      %121 = vector.broadcast %cst_73 : f32 to vector<8x1xf32>
      %122 = vector.broadcast %cst_74 : f32 to vector<8x1xf32>
      %123 = arith.select %120, %121, %122 : vector<8x1xi1>, vector<8x1xf32>
      %124 = arith.cmpf oeq, %93, %94 : vector<8x1xf32>
      %cst_75 = arith.constant 0.000000e+00 : f32
      %cst_76 = arith.constant 1.000000e+00 : f32
      %125 = vector.broadcast %cst_75 : f32 to vector<8x1xf32>
      %126 = vector.broadcast %cst_76 : f32 to vector<8x1xf32>
      %127 = arith.select %124, %125, %126 : vector<8x1xi1>, vector<8x1xf32>
      %128 = arith.mulf %108, %127 : vector<8x1xf32>
      %129 = arith.mulf %97, %127 : vector<8x1xf32>
      %130 = arith.subf %93, %94 : vector<8x1xf32>
      %131 = arith.subf %130, %123 : vector<8x1xf32>
      %cst_77 = arith.constant 3.000000e-01 : f32
      %132 = vector.broadcast %cst_77 : f32 to vector<8x1xf32>
      %133 = arith.mulf %132, %131 : vector<8x1xf32>
      %134 = arith.addf %129, %133 : vector<8x1xf32>
      %cst_78 = arith.constant 0.000000e+00 : f32
      %135 = vector.broadcast %cst_78 : f32 to vector<8x1xf32>
      %136 = arith.subf %135, %123 : vector<8x1xf32>
      %137 = arith.subf %128, %134 : vector<8x1xf32>
      %138 = arith.mulf %136, %137 : vector<8x1xf32>
      %cst_79 = arith.constant 3.000000e-01 : f32
      %139 = vector.broadcast %cst_79 : f32 to vector<8x1xf32>
      %140 = arith.addf %138, %139 : vector<8x1xf32>
      %cst_80 = arith.constant 0.000000e+00 : f32
      %141 = vector.broadcast %cst_80 : f32 to vector<8x1xf32>
      %142 = arith.maximumf %140, %141 : vector<8x1xf32>
      %cst_81 = arith.constant 1.000000e+00 : f32
      %143 = vector.broadcast %cst_81 : f32 to vector<8x1xf32>
      %144 = arith.subf %93, %143 : vector<8x1xf32>
      %cst_82 = arith.constant 3.000000e-01 : f32
      %145 = vector.broadcast %cst_82 : f32 to vector<8x1xf32>
      %146 = arith.mulf %145, %144 : vector<8x1xf32>
      %147 = arith.addf %97, %146 : vector<8x1xf32>
      %148 = arith.subf %119, %147 : vector<8x1xf32>
      %cst_83 = arith.constant 0.000000e+00 : f32
      %149 = vector.broadcast %cst_83 : f32 to vector<8x1xf32>
      %150 = arith.subf %149, %148 : vector<8x1xf32>
      %cst_84 = arith.constant 3.000000e-01 : f32
      %151 = vector.broadcast %cst_84 : f32 to vector<8x1xf32>
      %152 = arith.addf %150, %151 : vector<8x1xf32>
      %cst_85 = arith.constant 0.000000e+00 : f32
      %153 = vector.broadcast %cst_85 : f32 to vector<8x1xf32>
      %154 = arith.maximumf %152, %153 : vector<8x1xf32>
      %155 = arith.cmpf ogt, %119, %147 : vector<8x1xf32>
      %156 = arith.extui %155 : vector<8x1xi1> to vector<8x1xi32>
      %157 = arith.sitofp %156 : vector<8x1xi32> to vector<8x1xf32>
      %c0_86 = arith.constant 0 : index
      %c0_87 = arith.constant 0 : index
      %158 = vector.load %arg10[%c0_86, %c0_87] : memref<8x1xf32, #tpu.memory_space<vmem>>, vector<8x1xf32>
      tpu.vector_store %arg10[%c0_86, %c0_87], %142 {strides = array<i32>} : memref<8x1xf32, #tpu.memory_space<vmem>>, vector<8x1xf32>,
      %c0_88 = arith.constant 0 : index
      %c0_89 = arith.constant 0 : index
      %159 = vector.load %arg11[%c0_88, %c0_89] : memref<8x1xf32, #tpu.memory_space<vmem>>, vector<8x1xf32>
      tpu.vector_store %arg11[%c0_88, %c0_89], %154 {strides = array<i32>} : memref<8x1xf32, #tpu.memory_space<vmem>>, vector<8x1xf32>,
      %c0_90 = arith.constant 0 : index
      %c0_91 = arith.constant 0 : index
      %160 = vector.load %arg12[%c0_90, %c0_91] : memref<8x1xf32, #tpu.memory_space<vmem>>, vector<8x1xf32>
      tpu.vector_store %arg12[%c0_90, %c0_91], %157 {strides = array<i32>} : memref<8x1xf32, #tpu.memory_space<vmem>>, vector<8x1xf32>,
    } else {
    }
    return
  }
  func.func @transform_0(%arg0: i32, %arg1: i32) -> (i32, i32) {
    %c0_i32 = arith.constant 0 : i32
    %c0_i32_0 = arith.constant 0 : i32
    return %arg0, %c0_i32 : i32, i32
  }
  func.func @transform_1(%arg0: i32, %arg1: i32) -> (i32, i32) {
    %c0_i32 = arith.constant 0 : i32
    %c0_i32_0 = arith.constant 0 : i32
    return %arg1, %c0_i32 : i32, i32
  }
  func.func @transform_2(%arg0: i32, %arg1: i32) -> (i32, i32) {
    %c0_i32 = arith.constant 0 : i32
    %c0_i32_0 = arith.constant 0 : i32
    return %arg0, %c0_i32 : i32, i32
  }
  func.func @transform_3(%arg0: i32, %arg1: i32) -> (i32, i32) {
    %c0_i32 = arith.constant 0 : i32
    %c0_i32_0 = arith.constant 0 : i32
    return %arg1, %c0_i32 : i32, i32
  }
  func.func @transform_4(%arg0: i32, %arg1: i32) -> (i32, i32) {
    %c0_i32 = arith.constant 0 : i32
    %c0_i32_0 = arith.constant 0 : i32
    return %arg0, %c0_i32 : i32, i32
  }
  func.func @transform_5(%arg0: i32, %arg1: i32) -> (i32, i32) {
    %c0_i32 = arith.constant 0 : i32
    %c0_i32_0 = arith.constant 0 : i32
    return %c0_i32, %arg1 : i32, i32
  }
  func.func @transform_6(%arg0: i32, %arg1: i32) -> (i32, i32) {
    %c0_i32 = arith.constant 0 : i32
    %c0_i32_0 = arith.constant 0 : i32
    return %arg0, %c0_i32 : i32, i32
  }
  func.func @transform_7(%arg0: i32, %arg1: i32) -> (i32, i32) {
    %c0_i32 = arith.constant 0 : i32
    %c0_i32_0 = arith.constant 0 : i32
    return %c0_i32, %arg1 : i32, i32
  }
  func.func @transform_8(%arg0: i32, %arg1: i32) -> (i32, i32) {
    %c0_i32 = arith.constant 0 : i32
    %c0_i32_0 = arith.constant 0 : i32
    return %arg0, %c0_i32 : i32, i32
  }
  func.func @transform_9(%arg0: i32, %arg1: i32) -> (i32, i32) {
    %c0_i32 = arith.constant 0 : i32
    %c0_i32_0 = arith.constant 0 : i32
    return %arg0, %c0_i32 : i32, i32
  }
  func.func @transform_10(%arg0: i32, %arg1: i32) -> (i32, i32) {
    %c0_i32 = arith.constant 0 : i32
    %c0_i32_0 = arith.constant 0 : i32
    return %arg0, %c0_i32 : i32, i32
  }
}

</mosaic_0001>

<bundles_post_ra>
// kernel: tpu_custom_call.1
= control target key start
LH: loop header
LB: loop body
LE: loop exit
PB: predicated region body
PF: predicated region fallthrough
CT: control target
= control target key end

     0   :  { %16 = vsyncpa [#allocation8], 0  ;;  %s681_s0 = inlined_call_operand.vmem [shape: f32[8,32], index: 0, kind: input, shape index: {}]   ;;  %s682_s1 = inlined_call_operand.vmem [shape: f32[8,32], index: 1, kind: input, shape index: {}]   ;;  %s683_s2 = inlined_call_operand.hbm [shape: f32[8,32], index: 2, kind: input, shape index: {}]   ;;  %s684_s3 = inlined_call_operand.hbm [shape: f32[8,32], index: 3, kind: input, shape index: {}]   ;;  %s685_s4 = inlined_call_operand.vmem [shape: f32[8,1], index: 4, kind: input, shape index: {}]   ;;  %s686_s5 = inlined_call_operand.vmem [shape: f32[1,8], index: 5, kind: input, shape index: {}]   ;;  %s687_s6 = inlined_call_operand.vmem [shape: s32[8,1], index: 6, kind: input, shape index: {}]   ;;  %s688_s7 = inlined_call_operand.vmem [shape: s32[1,8], index: 7, kind: input, shape index: {}]   ;;  %s689_s8 = inlined_call_operand.vmem [shape: f32[8,1], index: 8, kind: output, shape index: {0}]   ;;  %s690_s9 = inlined_call_operand.vmem [shape: f32[8,1], index: 9, kind: output, shape index: {1}]   ;;  %s691_s10 = inlined_call_operand.vmem [shape: f32[8,1], index: 10, kind: output, shape index: {2}]  }
   0x1   :  { %17 = vsyncpa [#allocation10], 0  ;;  %s502_s13 = smov [#allocation7]   ;;  %s503_s15 = smov [#allocation9]  }
   0x2   :  { %s28_s14 = sshll.u32 %s502_s13, 4  ;;  %s38_s16 = sshll.u32 %s503_s15, 4  ;;  %s29_s14 = int_to_ptr.vmem [resolvable:$true] %s28_s14  ;;  %s39_s16 = int_to_ptr.vmem [resolvable:$true] %s38_s16 }
   0x3   :  { %s466_s17 = scalar_lea.vmem %s29_s14, 128  ;;  %p471_p1 = scmp.lt.s32.totalorder %s29_s14, %s29_s14 }
   0x4   :  { %p467_p0 = scmp.ne.s32.totalorder %s29_s14, %s466_s17  ;;  %p472_p2 = scmp.lt.s32.totalorder %s466_s17, %s466_s17 }
   0x6   :  { %p473_p3 = por %p472_p2, %p471_p1 }
   0x8   :  { %p474_p4 = pnand %p473_p3, %p467_p0 }
   0xa   :  { %477 = shalt.err (!%p474_p4)
}
   0xb   :  { %31 = dma.hbm_to_vmem [thread:$0]  %s683_s2, 128, %s29_s14, [#allocation8]  }
   0xc   :  { %s486_s20 = scalar_lea.vmem %s39_s16, 128  ;;  %p491_p6 = scmp.lt.s32.totalorder %s39_s16, %s39_s16 }
   0xd   :  { %p487_p5 = scmp.ne.s32.totalorder %s39_s16, %s486_s20  ;;  %p492_p7 = scmp.lt.s32.totalorder %s486_s20, %s486_s20 }
   0xf   :  { %p493_p8 = por %p492_p7, %p491_p6 }
  0x11   :  { %p494_p9 = pnand %p493_p8, %p487_p5 }
  0x13   :  { %497 = shalt.err (!%p494_p9)
}
  0x14   :  { %41 = dma.hbm_to_vmem [thread:$0]  %s684_s3, 128, %s39_s16, [#allocation10]  }
  0x15   :  { %498 = dma.done.wait [#allocation8], 128  }
  0x16   :  { %499 = vsyncadd [#allocation8], 4294967168 }
  0x17   :  { %500 = dma.done.wait [#allocation10], 128  }
  0x18   :  { %501 = vsyncadd [#allocation10], 4294967168  ;;  %vm60_vm0 = vcmask 7168   ;;  %v504_v0 = vmov 0.0   ;;  %vm505_vm1 = vmmov 0   ;;  %v506_v1 = vmov 0  }
  0x19   :  { %64 = vst.msk [vmem:[#allocation5] sm:$0xff] %vm60_vm0, %v504_v0  ;;  %433 = vmatprep.subr.mxu0 %v504_v0  ;;  %63 = vst.msk [vmem:[#allocation3] sm:$0xff] %vm60_vm0, %v504_v0  ;;  %435 = vmatprep.mubr.msk.f32.mxu0 %vm505_vm1, %v504_v0  ;;  %vm69_vm2 = vcmask 261120   ;;  %v68_v2 = vld [vmem:[%s682_s1] sm:$0xff]  ;;  %vm256_vm3 = vcmask 64512   ;;  %v147_v22 = vld [vmem:[#allocation9] sm:$0xff]  ;;  %v254_v24 = vlaneseq }
  0x1a   :  { %451 = vset.pattern.permute.xlu0 %v506_v1  ;;  %438 = vmatprep.subr.mxu1 %v504_v0  ;;  %v66_v3 = vld [vmem:[%s681_s0] sm:$0xff]  ;;  %v507_v21 = vmov -1e+30   ;;  %v146_v23 = vld [vmem:[#allocation7] sm:$0xff]  ;;  %v508_v61 = vmov 1e+30  }
  0x1b   :  { %440 = vmatprep.mubr.msk.f32.mxu1 %vm505_vm1, %v504_v0  ;;  %v224_v4 = vld [vmem:[%s685_s4] sm:$0xff]  ;;  %434 = vmatpush3.xpose.msk.msra.mxu0 %vm69_vm2, %v68_v2  ;;  %v67_v5 = vmul.f32 -2.0, %v66_v3  ;;  %61 = vst.msk [vmem:[#allocation2] sm:$0xff] %vm60_vm0, %v507_v21  ;;  %62 = vst.msk [vmem:[#allocation4] sm:$0xff] %vm60_vm0, %v507_v21  ;;  %v255_v25 = vand.u32 127, %v254_v24 }
  0x1c   :  { %228 = vperm.xlu0 %451, %v224_v4   ;;  %v240_v6 = vld [vmem:[%s687_s6] sm:$0xff]  ;;  %439 = vmatpush3.xpose.msk.msra.mxu1 %vm69_vm2, %v147_v22  ;;  %65 = vst.msk [vmem:[#allocation6] sm:$0xff] %vm60_vm0, %v508_v61 }
  0x1d   :  { %v422_v7 = vld [vmem:[%s686_s5] ss:$0 sm:$0xff] }
  0x1e   :  { %436 = vmatmul.mubr.msk.f32.vlgmr.msra.gmra.mxu0 %vm69_vm2, %v67_v5  ;;  %v423_v13 = vld [vmem:[%s688_s7] ss:$0 sm:$0xff] }
  0x1f   :  { %441 = vmatmul.mubr.msk.f32.vlgmr.msra.gmra.mxu1 %vm69_vm2, %v146_v23 }
  0x20   :  { %243 = vperm.xlu0 %451, %v240_v6  }
  0x22   :  { %v604_v26 = vld [vmem:[#allocation2] sm:$0xff]  ;;  %v620_v46 = vld [vmem:[#allocation4] sm:$0xff] }
  0x23   :  { %v331_v4 = vld [vmem:[#allocation6] sm:$0xff] }
  0x97   :  { %v229_v8 = vpop.permute.xlu0 %228 }
  0x98   :  { %v237_v9 = vadd.f32 %v422_v7, %v229_v8 }
  0x9b   :  { %v244_v14 = vpop.permute.xlu0 %243 }
  0x9c   :  { %vm249_vm4 = vcmp.eq.s32.totalorder %v244_v14, %v423_v13 }
  0xde   :  { %v142_v10 = vpop.f32.mrf.mxu0 }
  0xdf   :  { %v238_v11 = vadd.f32 %v237_v9, %v142_v10  ;;  %v220_v37 = vpop.f32.mrf.mxu1  ;;  %v312_v9 = vld [vmem:[#allocation3] sm:$0xff] }
  0xe0   :  { %v437_v12 = vpop.f32.mrf.mxu0 }
  0xe1   :  { %v239_v15 = vmax.f32 %v238_v11, 1e-12  ;;  %v442_v38 = vpop.f32.mrf.mxu1 }
  0xe3   :  { %v424_v16 = vadd.f32 -9999999.0, %v239_v15  ;;  %v252_v17 = vadd.f32 9999999.0, %v239_v15 }
  0xe5   :  { %v251_v18 = vsel %vm249_vm4, %v239_v15, %v424_v16  ;;  %v253_v19 = vsel %vm249_vm4, %v252_v17, %v239_v15 }
  0xe6   :  { %v257_v20 = vsel %vm256_vm3, %v251_v18, -inf  ;;  %v308_v59 = vsel %vm256_vm3, %v253_v19, inf }
  0xe7   :  { %258 = vmax.xlane.f32.xlu1 %v257_v20 }
 0x170   :  { %v606_v27 = vpop.xlane.xlu1 %258 }
 0x171   :  { %vm260_vm5 = vcmp.eq.f32.partialorder %v251_v18, %v606_v27  ;;  %vm315_vm6 = vcmp.gt.f32.partialorder %v606_v27, %v604_v26  ;;  %vm323_vm9 = vcmp.gt.f32.partialorder %v606_v27, %v620_v46 }
 0x172   :  { %v261_v28 = vsel %vm260_vm5, %v255_v25, 8  ;;  %v316_v29 = vsel %vm315_vm6, %v606_v27, %v604_v26  ;;  %v324_v50 = vsel %vm323_vm9, %v606_v27, %v620_v46 }
 0x173   :  { %v262_v30 = vsel %vm256_vm3, %v261_v28, 2147483647  ;;  %318 = vst.msk [vmem:[#allocation2] sm:$0xff] %vm60_vm0, %v316_v29 }
 0x174   :  { %v264_v31 = vshra.s32 %v262_v30, 16  ;;  %v263_v33 = vand.u32 65535, %v262_v30 }
 0x176   :  { %v266_v32 = vcvt.s32.f32 %v264_v31  ;;  %v265_v35 = vcvt.s32.f32 %v263_v33 }
 0x178   :  { %267 = vmin.xlane.f32.xlu1 %v266_v32 }
 0x17a   :  { %v337_v12 = vld [vmem:[#allocation2] sm:$0xff] }
 0x17b   :  { %v342_v14 = vmax.f32 %v337_v12, 1e-12 }
 0x17d   :  { %452 = vrsqrt.f32 %v342_v14  ;;  %vm345_vm15 = vcmp.eq.f32.partialorder %v342_v14, inf  ;;  %v348_v31 = vand.u32 2147483648, %v342_v14 }
 0x18a   :  { %v453_v19 = vpop.eup %452 }
 0x18b   :  { %v344_v21 = vmul.f32 %v453_v19, %v342_v14 }
 0x201   :  { %v268_v34 = vpop.xlane.xlu1 %267 }
 0x202   :  { %vm269_vm7 = vcmp.eq.f32.partialorder %v266_v32, %v268_v34  ;;  %v274_v39 = vcvt.f32.s32 %v268_v34 }
 0x203   :  { %v270_v36 = vsel %vm269_vm7, %v265_v35, inf }
 0x204   :  { %271 = vmin.xlane.f32.xlu0 %v270_v36  ;;  %v275_v41 = vshll.u32 %v274_v39, 16 }
 0x28d   :  { %v272_v40 = vpop.xlane.xlu0 %271 }
 0x28e   :  { %v273_v42 = vcvt.f32.s32 %v272_v40 }
 0x290   :  { %v276_v43 = vadd.s32 %v275_v41, %v273_v42 }
 0x292   :  { %vm277_vm8 = vcmp.eq.s32.totalorder %v261_v28, %v276_v43  ;;  %v346_v28 = vsel %vm345_vm15, %v342_v14, %v344_v21 }
 0x293   :  { %v282_v44 = vsel %vm277_vm8, -1e+30, %v251_v18  ;;  %v278_v60 = vsel %vm277_vm8, %v220_v37, 0.0 }
 0x294   :  { %v283_v45 = vsel %vm256_vm3, %v282_v44, -inf  ;;  %v279_v62 = vsel %vm256_vm3, %v278_v60, 0.0 }
 0x295   :  { %284 = vmax.xlane.f32.xlu1 %v283_v45 }
 0x31e   :  { %v624_v47 = vpop.xlane.xlu1 %284 }
 0x31f   :  { %vm286_vm10 = vcmp.eq.f32.partialorder %v282_v44, %v624_v47  ;;  %vm321_vm11 = vcmp.gt.f32.partialorder %v624_v47, %v604_v26 }
 0x320   :  { %v322_v48 = vsel %vm321_vm11, %v624_v47, %v604_v26  ;;  %v287_v49 = vsel %vm286_vm10, %v255_v25, 8 }
 0x321   :  { %v288_v51 = vsel %vm256_vm3, %v287_v49, 2147483647  ;;  %v325_v52 = vsel %vm315_vm6, %v322_v48, %v324_v50 }
 0x322   :  { %v290_v53 = vshra.s32 %v288_v51, 16  ;;  %326 = vst.msk [vmem:[#allocation4] sm:$0xff] %vm60_vm0, %v325_v52  ;;  %v289_v55 = vand.u32 65535, %v288_v51 }
 0x324   :  { %v292_v54 = vcvt.s32.f32 %v290_v53  ;;  %v291_v57 = vcvt.s32.f32 %v289_v55 }
 0x326   :  { %293 = vmin.xlane.f32.xlu1 %v292_v54 }
 0x329   :  { %v338_v42 = vld [vmem:[#allocation4] sm:$0xff] }
 0x32a   :  { %v351_v43 = vadd.f32 9999999.0, %v338_v42  ;;  %vm350_vm5 = vcmp.ge.f32.partialorder %v338_v42, 0.0 }
 0x32c   :  { %v352_v44 = vsel %vm350_vm5, %v338_v42, %v351_v43 }
 0x32d   :  { %v353_v45 = vmax.f32 %v352_v44, 1e-12 }
 0x32f   :  { %vm356_vm7 = vcmp.eq.f32.partialorder %v353_v45, inf  ;;  %v359_v55 = vand.u32 2147483648, %v353_v45  ;;  %vm358_vm8 = vcmp.eq.f32.partialorder %v353_v45, 0.0 }
 0x3af   :  { %v294_v56 = vpop.xlane.xlu1 %293 }
 0x3b0   :  { %vm295_vm12 = vcmp.eq.f32.partialorder %v292_v54, %v294_v56  ;;  %v300_v63 = vcvt.f32.s32 %v294_v56 }
 0x3b1   :  { %v296_v58 = vsel %vm295_vm12, %v291_v57, inf }
 0x3b2   :  { %297 = vmin.xlane.f32.xlu1 %v296_v58  ;;  %v301_v2 = vshll.u32 %v300_v63, 16 }
 0x3b6   :  { %309 = vmin.xlane.f32.xlu1 %v308_v59  ;;  %v509_v59 = vmov 1.0  }
 0x3ba   :  { %280 = vadd.xlane.f32.xlu1 %v279_v62 }
 0x43b   :  { %v298_v1 = vpop.xlane.xlu1 %297 }
 0x43c   :  { %v299_v3 = vcvt.f32.s32 %v298_v1 }
 0x43e   :  { %v302_v5 = vadd.s32 %v301_v2, %v299_v3 }
 0x43f   :  { %v310_v6 = vpop.xlane.xlu1 %309 }
 0x440   :  { %v332_v7 = vmin.f32 %v331_v4, %v310_v6  ;;  %vm303_vm13 = vcmp.eq.s32.totalorder %v287_v49, %v302_v5 }
 0x441   :  { %v304_v8 = vsel %vm303_vm13, %v220_v37, 0.0 }
 0x442   :  { %333 = vst.msk [vmem:[#allocation6] sm:$0xff] %vm60_vm0, %v332_v7  ;;  %v305_v10 = vsel %vm256_vm3, %v304_v8, 0.0  ;;  %vm347_vm3 = vcmp.eq.f32.partialorder %v342_v14, 0.0 }
 0x443   :  { %306 = vadd.xlane.f32.xlu1 %v305_v10  ;;  %v281_v11 = vpop.xlane.xlu1 %280  ;;  %v349_v34 = vsel %vm347_vm3, %v348_v31, %v346_v28 }
 0x444   :  { %v319_v13 = vsel %vm315_vm6, %v281_v11, %v312_v9 }
 0x445   :  { %320 = vst.msk [vmem:[#allocation3] sm:$0xff] %vm60_vm0, %v319_v13 }
 0x449   :  { %v339_v15 = vld [vmem:[#allocation6] sm:$0xff] }
 0x44a   :  { %vm363_vm14 = vcmp.ge.f32.partialorder %v339_v15, 9999999.0  ;;  %v426_v16 = vadd.f32 -9999999.0, %v339_v15 }
 0x44c   :  { %v365_v17 = vsel %vm363_vm14, %v426_v16, %v339_v15  ;;  %v340_v20 = vld [vmem:[#allocation3] sm:$0xff] }
 0x44d   :  { %v366_v18 = vmax.f32 %v365_v17, 1e-12  ;;  %v427_v22 = vadd.f32 -1.0, %v340_v20 }
 0x44f   :  { %454 = vrsqrt.f32 %v366_v18  ;;  %vm369_vm1 = vcmp.eq.f32.partialorder %v366_v18, inf  ;;  %v372_v25 = vand.u32 2147483648, %v366_v18  ;;  %v392_v29 = vmul.f32 0.3, %v427_v22 }
 0x450   :  { %vm371_vm2 = vcmp.eq.f32.partialorder %v366_v18, 0.0  ;;  %456 = vrsqrt.f32 %v353_v45 }
 0x451   :  { %v393_v35 = vadd.f32 %v392_v29, %v349_v34 }
 0x45c   :  { %v455_v23 = vpop.eup %454 }
 0x45d   :  { %v368_v24 = vmul.f32 %v455_v23, %v366_v18  ;;  %v457_v48 = vpop.eup %456 }
 0x45e   :  { %v355_v53 = vmul.f32 %v457_v48, %v353_v45 }
 0x45f   :  { %v370_v30 = vsel %vm369_vm1, %v366_v18, %v368_v24 }
 0x460   :  { %v373_v32 = vsel %vm371_vm2, %v372_v25, %v370_v30  ;;  %v357_v54 = vsel %vm356_vm7, %v353_v45, %v355_v53 }
 0x461   :  { %v374_v33 = vadd.f32 9999999.0, %v373_v32  ;;  %v360_v56 = vsel %vm358_vm8, %v359_v55, %v357_v54 }
 0x462   :  { %v425_v58 = vadd.f32 -9999999.0, %v360_v56 }
 0x463   :  { %v375_v36 = vsel %vm363_vm14, %v374_v33, %v373_v32 }
 0x464   :  { %v394_v37 = vsub.f32 %v375_v36, %v393_v35  ;;  %vm398_vm4 = vcmp.gt.f32.partialorder %v375_v36, %v393_v35  ;;  %v362_v27 = vsel %vm350_vm5, %v360_v56, %v425_v58 }
 0x465   :  { %v428_v38 = vsel %vm398_vm4, 1.0, %v504_v0  ;;  %v314_v0 = vld [vmem:[#allocation5] sm:$0xff] }
 0x466   :  { %v395_v39 = vsub.f32 0.0, %v394_v37  ;;  %403 = vst.msk [vmem:[%s691_s10] sm:$0xff] %vm60_vm0, %v428_v38  ;;  %v328_v50 = vsel %vm323_vm9, %v281_v11, %v314_v0 }
 0x468   :  { %v396_v40 = vadd.f32 0.3, %v395_v39 }
 0x46a   :  { %v397_v41 = vmax.f32 %v396_v40, 0.0 }
 0x46c   :  { %402 = vst.msk [vmem:[%s690_s9] sm:$0xff] %vm60_vm0, %v397_v41 }
 0x4cc   :  { %v307_v49 = vpop.xlane.xlu1 %306 }
 0x4cd   :  { %v327_v51 = vsel %vm321_vm11, %v307_v49, %v312_v9 }
 0x4ce   :  { %v329_v52 = vsel %vm315_vm6, %v327_v51, %v328_v50 }
 0x4cf   :  { %330 = vst.msk [vmem:[#allocation5] sm:$0xff] %vm60_vm0, %v329_v52 }
 0x4d6   :  { %v341_v57 = vld [vmem:[#allocation5] sm:$0xff] }
 0x4d7   :  { %vm376_vm10 = vcmp.lt.f32.partialorder %v340_v20, %v341_v57  ;;  %vm378_vm12 = vcmp.eq.f32.partialorder %v340_v20, %v341_v57  ;;  %v382_v46 = vsub.f32 %v340_v20, %v341_v57 }
 0x4d8   :  { %v377_v47 = vsel %vm376_vm10, -1.0, %v509_v59  ;;  %v379_v60 = vsel %vm378_vm12, 0.0, %v509_v59 }
 0x4d9   :  { %v383_v61 = vsub.f32 %v382_v46, %v377_v47  ;;  %v381_v62 = vmul.f32 %v379_v60, %v349_v34  ;;  %v380_v63 = vmul.f32 %v379_v60, %v362_v27  ;;  %v386_v2 = vsub.f32 0.0, %v377_v47 }
 0x4db   :  { %v384_v26 = vmul.f32 0.3, %v383_v61 }
 0x4dd   :  { %v385_v1 = vadd.f32 %v384_v26, %v381_v62 }
 0x4df   :  { %v387_v3 = vsub.f32 %v380_v63, %v385_v1 }
 0x4e1   :  { %v388_v4 = vmul.f32 %v387_v3, %v386_v2 }
 0x4e3   :  { %v389_v5 = vadd.f32 0.3, %v388_v4 }
 0x4e5   :  { %v390_v6 = vmax.f32 %v389_v5, 0.0 }
 0x4e7   :  { %401 = vst.msk [vmem:[%s689_s8] sm:$0xff] %vm60_vm0, %v390_v6 }
 0x4e8   :  { %416 = vsyncpa [#allocation8], 1 }
 0x4e9   :  { %417 = vsyncpa [#allocation10], 1 }

</bundles_post_ra>
